<compile_context>
chip_gen: v7x
topology: tpu7x:2x2x1
jax: 0.10.0
libtpu: 0.0.40
codegen_flags: <defaults>
</compile_context>

<pallas_src>
import jax
import jax.numpy as jnp
from jax.experimental import pallas as pl
from jax.experimental.pallas import tpu as pltpu


def _copy_kernel(x_ref, o_ref):
    # Pure elementwise copy of the current VMEM tile.
    o_ref[...] = x_ref[...]


# dtype itemsize (bytes) -> sublane packing multiple for one vreg.
_SUBLANE_PACK = {4: 8, 2: 16, 1: 32}

_LANE = 128
_TARGET_TILE_BYTES = 4 * 1024 * 1024      # 4 MiB blocks (v6e/v7x sweet spot)
_VMEM_LIMIT_BYTES = 32 * 1024 * 1024      # > v5e's 16 MiB scoped default
_SINGLE_BLOCK_MAX_BYTES = 4 * 1024 * 1024 # budget for unaligned single-block path


def identity(x: jax.Array) -> jax.Array:
    """Identity.forward(x) -> x.

    JAX arrays are immutable, so returning the input is semantically identical
    to the PyTorch module and removes all HBM traffic and launch overhead.
    """
    return x


def identity_copy(x: jax.Array) -> jax.Array:
    """Identity that materializes a distinct output buffer via a Pallas copy.

    Only needed when a caller requires a fresh buffer; otherwise use
    `identity` (free).
    """
    orig_shape = x.shape
    dtype = x.dtype
    total = x.size

    if total == 0:
        return x

    itemsize = jnp.dtype(dtype).itemsize
    sub = _SUBLANE_PACK.get(itemsize, 8)
    bytes_accessed = 2 * total * itemsize  # one read + one write of the tensor
    cost = pl.CostEstimate(flops=0, transcendentals=0,
                           bytes_accessed=bytes_accessed)

    if total % _LANE == 0:
        # Lane-dense (rows, 128) slab; contiguous reshape = no data movement.
        rows = total // _LANE
        x2d = x.reshape(rows, _LANE)

        tile_rows = max(sub, _TARGET_TILE_BYTES // (_LANE * itemsize))
        tile_rows = (tile_rows // sub) * sub  # dtype sublane-packing multiple
        if rows <= tile_rows:
            # Single full-extent block (allowed even when rows % sub != 0).
            tile_rows = rows

        grid = (pl.cdiv(rows, tile_rows),)  # partial last block masked by Pallas

        out2d = pl.pallas_call(
            _copy_kernel,
            out_shape=jax.ShapeDtypeStruct((rows, _LANE), dtype),
            grid_spec=pltpu.PrefetchScalarGridSpec(
                num_scalar_prefetch=0,
                grid=grid,
                in_specs=[pl.BlockSpec((tile_rows, _LANE), lambda i: (i, 0))],
                out_specs=pl.BlockSpec((tile_rows, _LANE), lambda i: (i, 0)),
            ),
            compiler_params=pltpu.CompilerParams(
                dimension_semantics=("parallel",),
                vmem_limit_bytes=_VMEM_LIMIT_BYTES,
            ),
            cost_estimate=cost,
        )(x2d)
        return out2d.reshape(orig_shape)

    # Unaligned flat size.  Small tensors: copy as one full-extent block
    # (block_shape equal to the full array dims is always legal), keeping the
    # "returns a fresh buffer" contract consistent with the aligned path.
    if total * itemsize <= _SINGLE_BLOCK_MAX_BYTES:
        x2d = x.reshape(1, total)  # contiguous reshape: no data movement
        out2d = pl.pallas_call(
            _copy_kernel,
            out_shape=jax.ShapeDtypeStruct((1, total), dtype),
            compiler_params=pltpu.CompilerParams(
                vmem_limit_bytes=_VMEM_LIMIT_BYTES,
            ),
            cost_estimate=cost,
        )(x2d)
        return out2d.reshape(orig_shape)

    # Huge unaligned tensors: true-Identity zero-copy semantics.
    # TODO(synk): chunked 1D path (multiple-of-128 blocks, masked last block)
    # if a fresh buffer is ever required for large non-128-divisible sizes.
    return x


if __name__ == "__main__":
    key = jax.random.PRNGKey(0)

    # NCHW input consistent with a conv-style NAS module.
    x = jax.random.normal(key, (2, 4, 16, 16), dtype=jnp.float32)

    # Fast path: Identity is a no-op (this is what the module semantics imply).
    y = identity(x)
    assert y is x

    # Pallas copy path (distinct output buffer), f32 / lane-aligned.
    yc = identity_copy(x)
    jax.block_until_ready(yc)
    assert yc.shape == x.shape, (yc.shape, x.shape)
    assert yc.dtype == x.dtype, (yc.dtype, x.dtype)
    assert bool(jnp.all(yc == x)), "Identity copy mismatch (f32 kernel path)"

    # bf16 path (exercises the 16-sublane packing branch).
    xb = jax.random.normal(jax.random.PRNGKey(1), (2, 8, 16, 16)).astype(jnp.bfloat16)
    yb = identity_copy(xb)
    jax.block_until_ready(yb)
    assert yb.shape == xb.shape and yb.dtype == xb.dtype
    assert bool(jnp.all(yb == xb)), "Identity copy mismatch (bf16 kernel path)"

    # Unaligned size -> single full-extent block copy (fresh buffer).
    xu = jax.random.normal(jax.random.PRNGKey(2), (3, 5, 7), dtype=jnp.float32)
    yu = identity_copy(xu)
    jax.block_until_ready(yu)
    assert yu.shape == xu.shape and yu.dtype == xu.dtype
    assert bool(jnp.all(yu == xu)), "Identity copy mismatch (unaligned path)"

    print("KERNEL_OK")
</pallas_src>

<mosaic_0001>
module attributes {stable_mosaic.version = 11 : i64} {
  func.func @_copy_kernel(%arg0: i32, %arg1: memref<16x128xf32, #tpu.memory_space<vmem>>, %arg2: memref<16x128xf32, #tpu.memory_space<vmem>>) attributes {dimension_semantics = [#tpu.dimension_semantics<parallel>], iteration_bounds = array<i64: 1>, scalar_prefetch = 0 : i64, scratch_operands = 0 : i64, tpu.core_type = #tpu.core_type<tc>, window_params = [{transform_indices = @transform_0, window_bounds = array<i64: 16, 128>}, {transform_indices = @transform_1, window_bounds = array<i64: 16, 128>}]} {
    %c0 = arith.constant 0 : index
    %c0_0 = arith.constant 0 : index
    %0 = vector.load %arg1[%c0, %c0_0] : memref<16x128xf32, #tpu.memory_space<vmem>>, vector<16x128xf32>
    %c0_1 = arith.constant 0 : index
    %c0_2 = arith.constant 0 : index
    %1 = vector.load %arg2[%c0_1, %c0_2] : memref<16x128xf32, #tpu.memory_space<vmem>>, vector<16x128xf32>
    tpu.vector_store %arg2[%c0_1, %c0_2], %0 {strides = array<i32>} : memref<16x128xf32, #tpu.memory_space<vmem>>, vector<16x128xf32>,
    return
  }
  func.func @transform_0(%arg0: i32) -> (i32, i32) {
    %c0_i32 = arith.constant 0 : i32
    %c0_i32_0 = arith.constant 0 : i32
    return %arg0, %c0_i32 : i32, i32
  }
  func.func @transform_1(%arg0: i32) -> (i32, i32) {
    %c0_i32 = arith.constant 0 : i32
    %c0_i32_0 = arith.constant 0 : i32
    return %arg0, %c0_i32 : i32, i32
  }
}

</mosaic_0001>

<bundles_post_ra>
// kernel: tpu_custom_call.1
= control target key start
LH: loop header
LB: loop body
LE: loop exit
PB: predicated region body
PF: predicated region fallthrough
CT: control target
= control target key end

     0   :  { %6 = vsyncpa [#allocation3], 0  ;;  %s134_s0 = inlined_call_operand.hbm [shape: f32[16,128], index: 0, kind: input, shape index: {}]   ;;  %s135_s1 = inlined_call_operand.hbm [shape: f32[16,128], index: 1, kind: output, shape index: {}]  }
   0x1   :  { %7 = vsyncpa [#allocation4], 0  ;;  %s96_s6 = smov [#allocation2]   ;;  %s48_s10 = scalar_lea.hbm %s134_s0, 256 }
   0x2   :  { %s13_s7 = sshll.u32 %s96_s6, 4  ;;  %p49_p0 = scmp.ne.s32.totalorder %s134_s0, %s48_s10  ;;  %s14_s7 = int_to_ptr.vmem [resolvable:$true] %s13_s7 }
   0x3   :  { %p52_p1 = scmp.lt.u32.totalorder %s48_s10, %s134_s0 }
   0x5   :  { %p54_p2 = pnand %p52_p1, %p49_p0 }
   0x7   :  { %57 = shalt.err (!%p54_p2)
}
   0x8   :  { %s58_s15 = scalar_lea.vmem %s14_s7, 256  ;;  %p63_p4 = scmp.lt.s32.totalorder %s14_s7, %s14_s7 }
   0x9   :  { %p59_p3 = scmp.ne.s32.totalorder %s14_s7, %s58_s15  ;;  %p64_p5 = scmp.lt.s32.totalorder %s58_s15, %s58_s15 }
   0xb   :  { %p65_p6 = por %p64_p5, %p63_p4 }
   0xd   :  { %p66_p7 = pnand %p65_p6, %p59_p3 }
   0xf   :  { %69 = shalt.err (!%p66_p7)
}
  0x10   :  { %s97_s16 = smov 128   ;;  %s98_s17 = smov 8  }
  0x11   :  { %19 = dma.hbm_to_vmem [thread:$0]  %s134_s0, 256, %s14_s7, [#allocation3], %s97_s16, %s97_s16, %s98_s17  }
  0x12   :  { %92 = dma.done.wait [#allocation3], 256  }
  0x13   :  { %93 = vsyncadd [#allocation3], 4294967040  ;;  %s99_s20 = smov [#allocation5]   ;;  %v23_v0 = vld [vmem:[#allocation2] sm:$0xff]  ;;  %v24_v1 = vld [vmem:[#allocation2 + $0x8] sm:$0xff] }
  0x14   :  { %s32_s21 = sshll.u32 %s99_s20, 4  ;;  %25 = vst [vmem:[#allocation5] sm:$0xff] %v23_v0  ;;  %26 = vst [vmem:[#allocation5 + $0x8] sm:$0xff] %v24_v1  ;;  %s33_s21 = int_to_ptr.vmem [resolvable:$true] %s32_s21 }
  0x15   :  { %s70_s22 = scalar_lea.vmem %s33_s21, 256  ;;  %p75_p9 = scmp.lt.s32.totalorder %s33_s21, %s33_s21 }
  0x16   :  { %p71_p8 = scmp.ne.s32.totalorder %s33_s21, %s70_s22  ;;  %p76_p10 = scmp.lt.s32.totalorder %s70_s22, %s70_s22 }
  0x18   :  { %p77_p11 = por %p76_p10, %p75_p9 }
  0x1a   :  { %p78_p12 = pnand %p77_p11, %p71_p8 }
  0x1c   :  { %81 = shalt.err (!%p78_p12)
}
  0x1d   :  { %s82_s0 = scalar_lea.hbm %s135_s1, 256 }
  0x1e   :  { %p83_p13 = scmp.ne.s32.totalorder %s135_s1, %s82_s0  ;;  %p86_p0 = scmp.lt.u32.totalorder %s82_s0, %s135_s1 }
  0x20   :  { %p88_p1 = pnand %p86_p0, %p83_p13 }
  0x22   :  { %91 = shalt.err (!%p88_p1)
}
  0x23   :  { %38 = dma.vmem_to_hbm [thread:$0]  %s33_s21, 256, %s135_s1, [#allocation4], %s97_s16, %s97_s16, %s98_s17  }
  0x24   :  { %94 = dma.done.wait [#allocation4], 256  }
  0x25   :  { %95 = vsyncadd [#allocation4], 4294967040 }
  0x26   :  { %42 = vsyncpa [#allocation3], 1 }
  0x27   :  { %43 = vsyncpa [#allocation4], 1 }

</bundles_post_ra>
